<compile_context>
chip_gen: v7x
topology: tpu7x:2x2x1
jax: 0.10.0
libtpu: 0.0.40
codegen_flags: <defaults>
</compile_context>

<pallas_src>
import functools

import jax
import jax.numpy as jnp
import numpy as np
from jax.experimental import pallas as pl
from jax.experimental.pallas import tpu as pltpu


def _round_up(x, m):
    return ((x + m - 1) // m) * m


def _lowrank_kernel(x_ref, us_ref, vt_ref, b_ref, o_ref, xu_ref, *, activation):
    """One (TB, TN) output tile of activation(X @ (U S) @ V.T + b).

    xu_ref is a persistent VMEM scratch holding XU = X @ US for the current
    batch tile; it is recomputed only when the dim_out grid index j == 0.
    """
    @pl.when(pl.program_id(1) == 0)
    def _():
        xu_ref[...] = jnp.dot(x_ref[...], us_ref[...],
                              preferred_element_type=jnp.float32)

    # (TB, rank) @ (rank, TN) on the MXU with f32 accumulation.
    xu = xu_ref[...].astype(vt_ref.dtype)
    y = jnp.dot(xu, vt_ref[...], preferred_element_type=jnp.float32)
    y = y + b_ref[...]                      # bias kept in f32
    if activation == "relu":
        y = jnp.maximum(y, 0.0)
    elif activation == "linear":
        pass
    else:
        raise ValueError(f"Activation {activation} is not a defined activation")
    o_ref[...] = y.astype(o_ref.dtype)


def vanilla_lowrank_forward(x, U, S, V, b, *, activation="relu",
                            tb_max=512, tn_max=2048):
    """Pallas-backed forward of VanillaLowRank: activation(X @ (U S V^T) + b)."""
    B, dim_in = x.shape
    dim_out, rank = V.shape
    assert U.shape == (dim_in, rank)
    assert S.shape == (rank, rank)
    assert b.shape == (dim_out,)

    compute_dtype = x.dtype
    itemsize = jnp.dtype(compute_dtype).itemsize

    # ---- parameter-only folding (done once, outside the kernel) -------------
    US = (U.astype(jnp.float32) @ S.astype(jnp.float32)).astype(compute_dtype)
    Vt = V.T.astype(compute_dtype)                    # (rank, dim_out)
    b2 = b.astype(jnp.float32).reshape(1, dim_out)    # bias stays f32

    # ---- VMEM budget: query the chip, fall back to v7x's 64 MiB worst case --
    try:
        vmem_cap = int(pltpu.get_tpu_info().vmem_capacity_bytes)
    except Exception:
        vmem_cap = 64 * 1024 * 1024
    vmem_budget = int(vmem_cap * 0.7)

    # ---- tile selection: lane-dense TN (multiple of 128 or full dim_out),
    #      TB multiple of 8 or full batch; ragged last blocks are masked ------
    tb_max = max(8, (int(tb_max) // 8) * 8)
    tn_max = max(128, (int(tn_max) // 128) * 128)
    TB = B if B <= tb_max else tb_max
    TN = dim_out if dim_out <= tn_max else tn_max

    def _working_set(tb, tn):
        return (2 * tb * dim_in * itemsize       # X tile, double-buffered
                + 2 * rank * tn * itemsize       # Vt tile, double-buffered
                + 2 * tb * tn * itemsize         # output tile, double-buffered
                + dim_in * rank * itemsize       # US, resident (single buffer)
                + 2 * tn * 4                     # bias tile (f32)
                + tb * rank * 4)                 # XU scratch (f32)

    # Shrink TB/TN until the working set fits (matters for very large
    # dim_in / dim_out, notably on v7x's 64 MiB VMEM).
    for _ in range(64):
        if _working_set(TB, TN) <= vmem_budget:
            break
        if TB > 8 and (TB * dim_in >= TN * (TB + rank) or TN <= 128):
            TB = max(8, ((TB // 2) // 8) * 8)
        elif TN > 128:
            TN = max(128, ((TN // 2) // 128) * 128)
        else:
            break

    # Give both v7x TensorCores a batch tile when the batch allows it
    # (on single-core v5e/v6e this only adds one cheap extra grid step).
    if B >= 16 and pl.cdiv(B, TB) < 2:
        TB = min(TB, _round_up((B + 1) // 2, 8))

    grid = (pl.cdiv(B, TB), pl.cdiv(dim_out, TN))
    vmem_limit = int(vmem_cap * 0.9)

    # Honest scheduling hint: low-rank op, not a dense B x dim_in x dim_out GEMM.
    cost = pl.CostEstimate(
        flops=2 * B * rank * (dim_in + dim_out),
        transcendentals=0,
        bytes_accessed=int(itemsize * (B * dim_in + dim_in * rank
                                       + rank * dim_out + B * dim_out)
                           + 4 * dim_out),
    )

    kernel = functools.partial(_lowrank_kernel, activation=activation)

    def _run(single_buffer_us):
        if single_buffer_us:
            # US's block index never changes; a second pipeline buffer only
            # wastes VMEM (dim_in * rank * itemsize).
            us_spec = pl.BlockSpec((dim_in, rank), lambda i, j: (0, 0),
                                   pipeline_mode=pl.Buffered(1))
        else:
            us_spec = pl.BlockSpec((dim_in, rank), lambda i, j: (0, 0))

        out = pl.pallas_call(
            kernel,
            out_shape=jax.ShapeDtypeStruct((B, dim_out), compute_dtype),
            grid_spec=pltpu.PrefetchScalarGridSpec(
                num_scalar_prefetch=0,
                grid=grid,
                in_specs=[
                    pl.BlockSpec((TB, dim_in), lambda i, j: (i, 0)),   # X
                    us_spec,                                           # U @ S
                    pl.BlockSpec((rank, TN), lambda i, j: (0, j)),     # V^T
                    pl.BlockSpec((1, TN), lambda i, j: (0, j)),        # bias
                ],
                out_specs=pl.BlockSpec((TB, TN), lambda i, j: (i, j)),
                scratch_shapes=[pltpu.VMEM((TB, rank), jnp.float32)],  # XU cache
            ),
            compiler_params=pltpu.CompilerParams(
                # batch axis megacore-shardable; dim_out sweep must stay
                # ordered on one core because of the XU scratch carry.
                dimension_semantics=("parallel", "arbitrary"),
                vmem_limit_bytes=vmem_limit,
            ),
            cost_estimate=cost,
        )(x, US, Vt, b2)
        # Block here so any failure of the single-buffer path is caught and we
        # can retry with default double-buffering (keeps the wrapper robust).
        return jax.block_until_ready(out)

    try:
        return _run(True)
    except Exception:
        return _run(False)


def make_params(key, dim_in, rank, dim_out):
    """Deterministic parameter init mirroring VanillaLowRank.__init__ (load=False)."""
    k_u, k_s, k_v, k_b = jax.random.split(key, 4)
    U = jax.random.normal(k_u, (dim_in, rank), dtype=jnp.float32)
    S = jax.random.normal(k_s, (rank, rank), dtype=jnp.float32)
    V = jax.random.normal(k_v, (dim_out, rank), dtype=jnp.float32)
    b = jax.random.normal(k_b, (dim_out,), dtype=jnp.float32)
    U, _ = jnp.linalg.qr(U, mode="reduced")   # keep only the orthonormal factor
    V, _ = jnp.linalg.qr(V, mode="reduced")
    return U, S, V, b


def reference_forward(x, U, S, V, b, *, activation="relu"):
    W = (U @ S) @ V.T
    y = x @ W + b
    if activation == "relu":
        y = jnp.maximum(y, 0.0)
    return y


if __name__ == "__main__":
    key = jax.random.PRNGKey(0)
    k1p, k1x, k2p, k2x, k3p, k3x = jax.random.split(key, 6)

    # Case 1: small single-tile shapes consistent with the module.
    B1, di1, r1, do1 = 8, 32, 8, 32
    U1, S1, V1, b1 = make_params(k1p, di1, r1, do1)
    x1 = jax.random.normal(k1x, (B1, di1), dtype=jnp.float32)
    y1 = jax.block_until_ready(vanilla_lowrank_forward(x1, U1, S1, V1, b1))
    np.testing.assert_allclose(np.asarray(y1),
                               np.asarray(reference_forward(x1, U1, S1, V1, b1)),
                               rtol=1e-5, atol=2e-5)

    # Case 2: multi-tile grid with ragged (masked) last blocks on both axes,
    # exercising the XU scratch reuse across dim_out tiles (no host padding).
    B2, di2, r2, do2 = 40, 64, 16, 200
    U2, S2, V2, b2 = make_params(k2p, di2, r2, do2)
    x2 = jax.random.normal(k2x, (B2, di2), dtype=jnp.float32)
    y2 = jax.block_until_ready(
        vanilla_lowrank_forward(x2, U2, S2, V2, b2, tb_max=16, tn_max=128))
    np.testing.assert_allclose(np.asarray(y2),
                               np.asarray(reference_forward(x2, U2, S2, V2, b2)),
                               rtol=1e-5, atol=2e-5)

    # Case 3: bf16 streaming path (X / params / output bf16, f32 accumulation).
    B3, di3, r3, do3 = 24, 48, 8, 160
    U3, S3, V3, b3 = make_params(k3p, di3, r3, do3)
    x3 = jax.random.normal(k3x, (B3, di3), dtype=jnp.float32).astype(jnp.bfloat16)
    y3 = jax.block_until_ready(vanilla_lowrank_forward(x3, U3, S3, V3, b3))
    y3_ref = reference_forward(x3.astype(jnp.float32), U3, S3, V3, b3)
    np.testing.assert_allclose(np.asarray(y3.astype(jnp.float32)),
                               np.asarray(y3_ref), rtol=5e-2, atol=1.5e-1)

    print("KERNEL_OK")
</pallas_src>

<mosaic_0001>
module attributes {stable_mosaic.version = 11 : i64} {
  func.func @_lowrank_kernel(%arg0: i32, %arg1: i32, %arg2: memref<8x32xf32, #tpu.memory_space<vmem>>, %arg3: memref<32x8xf32, #tpu.memory_space<vmem>>, %arg4: memref<8x32xf32, #tpu.memory_space<vmem>>, %arg5: memref<1x32xf32, #tpu.memory_space<vmem>>, %arg6: memref<8x32xf32, #tpu.memory_space<vmem>>, %arg7: memref<8x8xf32, #tpu.memory_space<vmem>>) attributes {dimension_semantics = [#tpu.dimension_semantics<parallel>, #tpu.dimension_semantics<arbitrary>], iteration_bounds = array<i64: 1, 1>, scalar_prefetch = 0 : i64, scratch_operands = 1 : i64, tpu.core_type = #tpu.core_type<tc>, window_params = [{transform_indices = @transform_0, window_bounds = array<i64: 8, 32>}, {pipeline_mode = #tpu.pipeline_mode<synchronous>, transform_indices = @transform_1, window_bounds = array<i64: 32, 8>}, {transform_indices = @transform_2, window_bounds = array<i64: 8, 32>}, {transform_indices = @transform_3, window_bounds = array<i64: 1, 32>}, {transform_indices = @transform_4, window_bounds = array<i64: 8, 32>}]} {
    %c0_i32 = arith.constant 0 : i32
    %0 = arith.cmpi eq, %arg1, %c0_i32 : i32
    %1 = arith.extui %0 : i1 to i32
    %c0_i32_0 = arith.constant 0 : i32
    %2 = arith.cmpi ne, %1, %c0_i32_0 : i32
    scf.if %2 {
      %c0_9 = arith.constant 0 : index
      %c0_10 = arith.constant 0 : index
      %12 = vector.load %arg2[%c0_9, %c0_10] : memref<8x32xf32, #tpu.memory_space<vmem>>, vector<8x32xf32>
      %c0_11 = arith.constant 0 : index
      %c0_12 = arith.constant 0 : index
      %13 = vector.load %arg3[%c0_11, %c0_12] : memref<32x8xf32, #tpu.memory_space<vmem>>, vector<32x8xf32>
      %cst_13 = arith.constant dense<0.000000e+00> : vector<8x8xf32>
      %14 = tpu.matmul %12, %13, %cst_13 {dimension_numbers = #tpu.dot_dimension_numbers<[1], [0], [0], [1], [0, 0, 1, 1], [], []>} : vector<8x32xf32>, vector<32x8xf32>, vector<8x8xf32> -> vector<8x8xf32>
      %c0_14 = arith.constant 0 : index
      %c0_15 = arith.constant 0 : index
      %15 = vector.load %arg7[%c0_14, %c0_15] : memref<8x8xf32, #tpu.memory_space<vmem>>, vector<8x8xf32>
      tpu.vector_store %arg7[%c0_14, %c0_15], %14 {strides = array<i32>} : memref<8x8xf32, #tpu.memory_space<vmem>>, vector<8x8xf32>,
    } else {
    }
    %c0 = arith.constant 0 : index
    %c0_1 = arith.constant 0 : index
    %3 = vector.load %arg7[%c0, %c0_1] : memref<8x8xf32, #tpu.memory_space<vmem>>, vector<8x8xf32>
    %c0_2 = arith.constant 0 : index
    %c0_3 = arith.constant 0 : index
    %4 = vector.load %arg4[%c0_2, %c0_3] : memref<8x32xf32, #tpu.memory_space<vmem>>, vector<8x32xf32>
    %cst = arith.constant dense<0.000000e+00> : vector<8x32xf32>
    %5 = tpu.matmul %3, %4, %cst {dimension_numbers = #tpu.dot_dimension_numbers<[1], [0], [0], [1], [0, 0, 1, 1], [], []>} : vector<8x8xf32>, vector<8x32xf32>, vector<8x32xf32> -> vector<8x32xf32>
    %c0_4 = arith.constant 0 : index
    %c0_5 = arith.constant 0 : index
    %6 = vector.load %arg5[%c0_4, %c0_5] : memref<1x32xf32, #tpu.memory_space<vmem>>, vector<1x32xf32>
    %7 = vector.broadcast %6 : vector<1x32xf32> to vector<8x32xf32>
    %8 = arith.addf %5, %7 : vector<8x32xf32>
    %cst_6 = arith.constant 0.000000e+00 : f32
    %9 = vector.broadcast %cst_6 : f32 to vector<8x32xf32>
    %10 = arith.maximumf %8, %9 : vector<8x32xf32>
    %c0_7 = arith.constant 0 : index
    %c0_8 = arith.constant 0 : index
    %11 = vector.load %arg6[%c0_7, %c0_8] : memref<8x32xf32, #tpu.memory_space<vmem>>, vector<8x32xf32>
    tpu.vector_store %arg6[%c0_7, %c0_8], %10 {strides = array<i32>} : memref<8x32xf32, #tpu.memory_space<vmem>>, vector<8x32xf32>,
    return
  }
  func.func @transform_0(%arg0: i32, %arg1: i32) -> (i32, i32) {
    %c0_i32 = arith.constant 0 : i32
    %c0_i32_0 = arith.constant 0 : i32
    return %arg0, %c0_i32 : i32, i32
  }
  func.func @transform_1(%arg0: i32, %arg1: i32) -> (i32, i32) {
    %c0_i32 = arith.constant 0 : i32
    %c0_i32_0 = arith.constant 0 : i32
    %c0_i32_1 = arith.constant 0 : i32
    return %c0_i32, %c0_i32_0 : i32, i32
  }
  func.func @transform_2(%arg0: i32, %arg1: i32) -> (i32, i32) {
    %c0_i32 = arith.constant 0 : i32
    %c0_i32_0 = arith.constant 0 : i32
    return %c0_i32, %arg1 : i32, i32
  }
  func.func @transform_3(%arg0: i32, %arg1: i32) -> (i32, i32) {
    %c0_i32 = arith.constant 0 : i32
    %c0_i32_0 = arith.constant 0 : i32
    return %c0_i32, %arg1 : i32, i32
  }
  func.func @transform_4(%arg0: i32, %arg1: i32) -> (i32, i32) {
    %c0_i32 = arith.constant 0 : i32
    return %arg0, %arg1 : i32, i32
  }
}

module attributes {stable_mosaic.version = 11 : i64} {
  func.func @_lowrank_kernel(%arg0: i32, %arg1: i32, %arg2: memref<8x32xf32, #tpu.memory_space<vmem>>, %arg3: memref<32x8xf32, #tpu.memory_space<vmem>>, %arg4: memref<8x32xf32, #tpu.memory_space<vmem>>, %arg5: memref<1x32xf32, #tpu.memory_space<vmem>>, %arg6: memref<8x32xf32, #tpu.memory_space<vmem>>, %arg7: memref<8x8xf32, #tpu.memory_space<vmem>>) attributes {dimension_semantics = [#tpu.dimension_semantics<parallel>, #tpu.dimension_semantics<arbitrary>], iteration_bounds = array<i64: 1, 1>, scalar_prefetch = 0 : i64, scratch_operands = 1 : i64, tpu.core_type = #tpu.core_type<tc>, window_params = [{transform_indices = @transform_0, window_bounds = array<i64: 8, 32>}, {pipeline_mode = #tpu.pipeline_mode<synchronous>, transform_indices = @transform_1, window_bounds = array<i64: 32, 8>}, {transform_indices = @transform_2, window_bounds = array<i64: 8, 32>}, {transform_indices = @transform_3, window_bounds = array<i64: 1, 32>}, {transform_indices = @transform_4, window_bounds = array<i64: 8, 32>}]} {
    %c0_i32 = arith.constant 0 : i32
    %0 = arith.cmpi eq, %arg1, %c0_i32 : i32
    %1 = arith.extui %0 : i1 to i32
    %c0_i32_0 = arith.constant 0 : i32
    %2 = arith.cmpi ne, %1, %c0_i32_0 : i32
    scf.if %2 {
      %c0_9 = arith.constant 0 : index
      %c0_10 = arith.constant 0 : index
      %12 = vector.load %arg2[%c0_9, %c0_10] : memref<8x32xf32, #tpu.memory_space<vmem>>, vector<8x32xf32>
      %c0_11 = arith.constant 0 : index
      %c0_12 = arith.constant 0 : index
      %13 = vector.load %arg3[%c0_11, %c0_12] : memref<32x8xf32, #tpu.memory_space<vmem>>, vector<32x8xf32>
      %cst_13 = arith.constant dense<0.000000e+00> : vector<8x8xf32>
      %14 = tpu.matmul %12, %13, %cst_13 {dimension_numbers = #tpu.dot_dimension_numbers<[1], [0], [0], [1], [0, 0, 1, 1], [], []>} : vector<8x32xf32>, vector<32x8xf32>, vector<8x8xf32> -> vector<8x8xf32>
      %c0_14 = arith.constant 0 : index
      %c0_15 = arith.constant 0 : index
      %15 = vector.load %arg7[%c0_14, %c0_15] : memref<8x8xf32, #tpu.memory_space<vmem>>, vector<8x8xf32>
      tpu.vector_store %arg7[%c0_14, %c0_15], %14 {strides = array<i32>} : memref<8x8xf32, #tpu.memory_space<vmem>>, vector<8x8xf32>,
    } else {
    }
    %c0 = arith.constant 0 : index
    %c0_1 = arith.constant 0 : index
    %3 = vector.load %arg7[%c0, %c0_1] : memref<8x8xf32, #tpu.memory_space<vmem>>, vector<8x8xf32>
    %c0_2 = arith.constant 0 : index
    %c0_3 = arith.constant 0 : index
    %4 = vector.load %arg4[%c0_2, %c0_3] : memref<8x32xf32, #tpu.memory_space<vmem>>, vector<8x32xf32>
    %cst = arith.constant dense<0.000000e+00> : vector<8x32xf32>
    %5 = tpu.matmul %3, %4, %cst {dimension_numbers = #tpu.dot_dimension_numbers<[1], [0], [0], [1], [0, 0, 1, 1], [], []>} : vector<8x8xf32>, vector<8x32xf32>, vector<8x32xf32> -> vector<8x32xf32>
    %c0_4 = arith.constant 0 : index
    %c0_5 = arith.constant 0 : index
    %6 = vector.load %arg5[%c0_4, %c0_5] : memref<1x32xf32, #tpu.memory_space<vmem>>, vector<1x32xf32>
    %7 = vector.broadcast %6 : vector<1x32xf32> to vector<8x32xf32>
    %8 = arith.addf %5, %7 : vector<8x32xf32>
    %cst_6 = arith.constant 0.000000e+00 : f32
    %9 = vector.broadcast %cst_6 : f32 to vector<8x32xf32>
    %10 = arith.maximumf %8, %9 : vector<8x32xf32>
    %c0_7 = arith.constant 0 : index
    %c0_8 = arith.constant 0 : index
    %11 = vector.load %arg6[%c0_7, %c0_8] : memref<8x32xf32, #tpu.memory_space<vmem>>, vector<8x32xf32>
    tpu.vector_store %arg6[%c0_7, %c0_8], %10 {strides = array<i32>} : memref<8x32xf32, #tpu.memory_space<vmem>>, vector<8x32xf32>,
    return
  }
  func.func @transform_0(%arg0: i32, %arg1: i32) -> (i32, i32) {
    %c0_i32 = arith.constant 0 : i32
    %c0_i32_0 = arith.constant 0 : i32
    return %arg0, %c0_i32 : i32, i32
  }
  func.func @transform_1(%arg0: i32, %arg1: i32) -> (i32, i32) {
    %c0_i32 = arith.constant 0 : i32
    %c0_i32_0 = arith.constant 0 : i32
    %c0_i32_1 = arith.constant 0 : i32
    return %c0_i32, %c0_i32_0 : i32, i32
  }
  func.func @transform_2(%arg0: i32, %arg1: i32) -> (i32, i32) {
    %c0_i32 = arith.constant 0 : i32
    %c0_i32_0 = arith.constant 0 : i32
    return %c0_i32, %arg1 : i32, i32
  }
  func.func @transform_3(%arg0: i32, %arg1: i32) -> (i32, i32) {
    %c0_i32 = arith.constant 0 : i32
    %c0_i32_0 = arith.constant 0 : i32
    return %c0_i32, %arg1 : i32, i32
  }
  func.func @transform_4(%arg0: i32, %arg1: i32) -> (i32, i32) {
    %c0_i32 = arith.constant 0 : i32
    return %arg0, %arg1 : i32, i32
  }
}

</mosaic_0001>

<bundles_post_ra>
// kernel: tpu_custom_call.1
= control target key start
LH: loop header
LB: loop body
LE: loop exit
PB: predicated region body
PF: predicated region fallthrough
CT: control target
= control target key end

     0   :  { %v263_v3 = vmov 0.0|0.0   ;;  %vm264_vm0 = vmmov 0   ;;  %v265_v6 = vmov 0.0   ;;  %s327_s0 = inlined_call_operand.vmem [shape: f32[8,32], index: 0, kind: input, shape index: {}]   ;;  %s328_s1 = inlined_call_operand.vmem [shape: f32[32,8], index: 1, kind: input, shape index: {}]   ;;  %s329_s2 = inlined_call_operand.vmem [shape: f32[8,32], index: 2, kind: input, shape index: {}]   ;;  %s330_s3 = inlined_call_operand.vmem [shape: f32[1,32], index: 3, kind: input, shape index: {}]   ;;  %s331_s4 = inlined_call_operand.hbm [shape: f32[8,32], index: 4, kind: output, shape index: {}]  }
   0x1   :  { %v23_v0 = vld [vmem:[%s328_s1] sm:$0xff]  ;;  %v24_v1 = vld [vmem:[%s328_s1 + $0x8] sm:$0xff]  ;;  %v25_v2 = vld [vmem:[%s328_s1 + $0x10] sm:$0xff]  ;;  %229 = vmatprep.subr.bf16.mxu0 %v263_v3  ;;  %221 = vmatprep.mubr.msk.f32.mxu0 %vm264_vm0, %v265_v6 }
   0x2   :  { %v230_v4 = vpack.c.bf16 %v24_v1, %v23_v0  ;;  %v26_v5 = vld [vmem:[%s328_s1 + $0x18] sm:$0xff] }
   0x3   :  { %9 = vsyncpa [#allocation4], 0  ;;  %224 = vmatprep.subr.mxu1 %v265_v6  ;;  %226 = vmatprep.mubr.msk.f32.mxu1 %vm264_vm0, %v265_v6  ;;  %v233_v7 = vpack.c.bf16 %v26_v5, %v25_v2  ;;  %v22_v8 = vld [vmem:[%s327_s0] sm:$0xff]  ;;  %vm27_vm1 = vcmask 261120   ;;  %vm101_vm2 = vcmask 64512   ;;  %s266_s0 = smov [#allocation3]  }
   0x4   :  { %231 = vmatpush3.bf16.msra.mxu0 %v230_v4  ;;  %v104_v9 = vld [vmem:[%s329_s2] sm:$0xff]  ;;  %s195_s28 = sshll.u32 %s266_s0, 4  ;;  %s196_s28 = int_to_ptr.vmem [resolvable:$true] %s195_s28 }
   0x5   :  { %232 = vmatprep.subr.bf16.mxu0 %v263_v3  ;;  %225 = vmatpush3.msra.mxu1 %v104_v9  ;;  %v204_v13 = vld [vmem:[%s330_s3] ss:$0 sm:$0xff]  ;;  %s239_s2 = scalar_lea.vmem %s196_s28, 128  ;;  %p244_p1 = scmp.lt.s32.totalorder %s196_s28, %s196_s28 }
   0x6   :  { %p240_p0 = scmp.ne.s32.totalorder %s196_s28, %s239_s2  ;;  %p245_p2 = scmp.lt.s32.totalorder %s239_s2, %s239_s2 }
   0x8   :  { %234 = vmatpush3.bf16.msra.mxu0 %v233_v7  ;;  %p246_p3 = por %p245_p2, %p244_p1 }
   0xa   :  { %p247_p4 = pnand %p246_p3, %p240_p0 }
   0xb   :  { %222 = vmatmul.mubr.msk.f32.vlgmr.msra.gmra.mrb[0].mxu0 %vm27_vm1, %v22_v8 }
  0xde   :  { %v97_v10 = vpop.f32.mrb[0].mxu0 }
  0xdf   :  { %102 = vst.msk [vmem:[#allocation2] sm:$0xff] %vm101_vm2, %v97_v10  ;;  %v223_v11 = vpop.f32.mrb[1].mxu0 }
  0xe6   :  { %v103_v12 = vld [vmem:[#allocation2] sm:$0xff] }
  0xe7   :  { %227 = vmatmul.mubr.msk.f32.vlgmr.msra.gmra.mrb[0].mxu1 %vm101_vm2, %v103_v12 }
 0x1ba   :  { %v182_v14 = vpop.f32.mrb[0].mxu1 }
 0x1bb   :  { %v183_v15 = vadd.f32 %v204_v13, %v182_v14  ;;  %v228_v16 = vpop.f32.mrb[1].mxu1 }
 0x1bd   :  { %v186_v17 = vmax.f32 %v183_v15, 0.0 }
 0x1bf   :  { %188 = vst.msk [vmem:[#allocation3] sm:$0xff] %vm27_vm1, %v186_v17 }
 0x1c0   :  { %250 = shalt.err (!%p247_p4)
}
 0x1c1   :  { %s251_s3 = scalar_lea.hbm %s331_s4, 128 }
 0x1c2   :  { %p252_p5 = scmp.ne.s32.totalorder %s331_s4, %s251_s3  ;;  %p255_p6 = scmp.lt.u32.totalorder %s251_s3, %s331_s4 }
 0x1c4   :  { %p257_p7 = pnand %p255_p6, %p252_p5 }
 0x1c6   :  { %260 = shalt.err (!%p257_p7)
}
 0x1c7   :  { %198 = dma.vmem_to_hbm [thread:$0]  %s196_s28, 128, %s331_s4, [#allocation4]  }
 0x1c8   :  { %261 = dma.done.wait [#allocation4], 128  }
 0x1c9   :  { %262 = vsyncadd [#allocation4], 4294967168 }
 0x1ca   :  { %202 = vsyncpa [#allocation4], 1 }

// kernel: tpu_custom_call.1
= control target key start
LH: loop header
LB: loop body
LE: loop exit
PB: predicated region body
PF: predicated region fallthrough
CT: control target
= control target key end

     0   :  { %v263_v3 = vmov 0.0|0.0   ;;  %vm264_vm0 = vmmov 0   ;;  %v265_v6 = vmov 0.0   ;;  %s327_s0 = inlined_call_operand.vmem [shape: f32[8,32], index: 0, kind: input, shape index: {}]   ;;  %s328_s1 = inlined_call_operand.vmem [shape: f32[32,8], index: 1, kind: input, shape index: {}]   ;;  %s329_s2 = inlined_call_operand.vmem [shape: f32[8,32], index: 2, kind: input, shape index: {}]   ;;  %s330_s3 = inlined_call_operand.vmem [shape: f32[1,32], index: 3, kind: input, shape index: {}]   ;;  %s331_s4 = inlined_call_operand.hbm [shape: f32[8,32], index: 4, kind: output, shape index: {}]  }
   0x1   :  { %v23_v0 = vld [vmem:[%s328_s1] sm:$0xff]  ;;  %v24_v1 = vld [vmem:[%s328_s1 + $0x8] sm:$0xff]  ;;  %v25_v2 = vld [vmem:[%s328_s1 + $0x10] sm:$0xff]  ;;  %229 = vmatprep.subr.bf16.mxu0 %v263_v3  ;;  %221 = vmatprep.mubr.msk.f32.mxu0 %vm264_vm0, %v265_v6 }
   0x2   :  { %v230_v4 = vpack.c.bf16 %v24_v1, %v23_v0  ;;  %v26_v5 = vld [vmem:[%s328_s1 + $0x18] sm:$0xff] }
   0x3   :  { %9 = vsyncpa [#allocation4], 0  ;;  %224 = vmatprep.subr.mxu1 %v265_v6  ;;  %226 = vmatprep.mubr.msk.f32.mxu1 %vm264_vm0, %v265_v6  ;;  %v233_v7 = vpack.c.bf16 %v26_v5, %v25_v2  ;;  %v22_v8 = vld [vmem:[%s327_s0] sm:$0xff]  ;;  %vm27_vm1 = vcmask 261120   ;;  %vm101_vm2 = vcmask 64512   ;;  %s266_s0 = smov [#allocation3]  }
   0x4   :  { %231 = vmatpush3.bf16.msra.mxu0 %v230_v4  ;;  %v104_v9 = vld [vmem:[%s329_s2] sm:$0xff]  ;;  %s195_s28 = sshll.u32 %s266_s0, 4  ;;  %s196_s28 = int_to_ptr.vmem [resolvable:$true] %s195_s28 }
   0x5   :  { %232 = vmatprep.subr.bf16.mxu0 %v263_v3  ;;  %225 = vmatpush3.msra.mxu1 %v104_v9  ;;  %v204_v13 = vld [vmem:[%s330_s3] ss:$0 sm:$0xff]  ;;  %s239_s2 = scalar_lea.vmem %s196_s28, 128  ;;  %p244_p1 = scmp.lt.s32.totalorder %s196_s28, %s196_s28 }
   0x6   :  { %p240_p0 = scmp.ne.s32.totalorder %s196_s28, %s239_s2  ;;  %p245_p2 = scmp.lt.s32.totalorder %s239_s2, %s239_s2 }
   0x8   :  { %234 = vmatpush3.bf16.msra.mxu0 %v233_v7  ;;  %p246_p3 = por %p245_p2, %p244_p1 }
   0xa   :  { %p247_p4 = pnand %p246_p3, %p240_p0 }
   0xb   :  { %222 = vmatmul.mubr.msk.f32.vlgmr.msra.gmra.mrb[0].mxu0 %vm27_vm1, %v22_v8 }
  0xde   :  { %v97_v10 = vpop.f32.mrb[0].mxu0 }
  0xdf   :  { %102 = vst.msk [vmem:[#allocation2] sm:$0xff] %vm101_vm2, %v97_v10  ;;  %v223_v11 = vpop.f32.mrb[1].mxu0 }
  0xe6   :  { %v103_v12 = vld [vmem:[#allocation2] sm:$0xff] }
  0xe7   :  { %227 = vmatmul.mubr.msk.f32.vlgmr.msra.gmra.mrb[0].mxu1 %vm101_vm2, %v103_v12 }
 0x1ba   :  { %v182_v14 = vpop.f32.mrb[0].mxu1 }
 0x1bb   :  { %v183_v15 = vadd.f32 %v204_v13, %v182_v14  ;;  %v228_v16 = vpop.f32.mrb[1].mxu1 }
 0x1bd   :  { %v186_v17 = vmax.f32 %v183_v15, 0.0 }
 0x1bf   :  { %188 = vst.msk [vmem:[#allocation3] sm:$0xff] %vm27_vm1, %v186_v17 }
 0x1c0   :  { %250 = shalt.err (!%p247_p4)
}
 0x1c1   :  { %s251_s3 = scalar_lea.hbm %s331_s4, 128 }
 0x1c2   :  { %p252_p5 = scmp.ne.s32.totalorder %s331_s4, %s251_s3  ;;  %p255_p6 = scmp.lt.u32.totalorder %s251_s3, %s331_s4 }
 0x1c4   :  { %p257_p7 = pnand %p255_p6, %p252_p5 }
 0x1c6   :  { %260 = shalt.err (!%p257_p7)
}
 0x1c7   :  { %198 = dma.vmem_to_hbm [thread:$0]  %s196_s28, 128, %s331_s4, [#allocation4]  }
 0x1c8   :  { %261 = dma.done.wait [#allocation4], 128  }
 0x1c9   :  { %262 = vsyncadd [#allocation4], 4294967168 }
 0x1ca   :  { %202 = vsyncpa [#allocation4], 1 }

</bundles_post_ra>
